<compile_context>
chip_gen: v7x
topology: tpu7x:2x2x1
jax: 0.10.0
libtpu: 0.0.40
codegen_flags: <defaults>
</compile_context>

<pallas_src>
import jax
import jax.numpy as jnp
from jax.experimental import pallas as pl
from jax.experimental.pallas import tpu as pltpu

SELU_ALPHA = 1.6732632423543772
SELU_SCALE = 1.0507009873554805


def _selu(x):
    # f32 elementwise on the VPU/EUP (kept out of bf16 on purpose — v5e).
    return SELU_SCALE * jnp.where(x > 0, x, SELU_ALPHA * (jnp.exp(x) - 1.0))


# ---------------------------------------------------------------------------
# Kernel 1: fused encoder + decoder-hidden + discriminator (single pallas_call)
#   encoded = tanh(mean_pool(emb, mask) @ W_enc)                     [B, H]
#   h_flat  = tanh(encoded @ W_dec_h  (+) pos_emb)  flattened        [B*T, H]
#   disc    = sigmoid(selu(selu([enc;prior] @ W1) @ W2) . w3 + b3)   [2B, 1]
# ---------------------------------------------------------------------------
def encode_disc_kernel(emb_ref, mask_ref, w_enc_ref, pos_ref, wdh_ref,
                       prior_ref, w1_ref, w2_ref, w3_ref, b3_ref,
                       enc_ref, hflat_ref, disc_ref):
    bf16 = jnp.bfloat16
    emb = emb_ref[...]                                   # [B, S, E] f32
    mask = mask_ref[...]                                 # [B, S]    f32

    # Masked mean pool.  At toy S (=8) this stays on the VPU; for realistic S
    # express it as a batched MXU contraction ('bks,bse->bke') instead.
    pooled = jnp.sum(emb * mask[:, :, None], axis=1)     # [B, E]
    denom = jnp.maximum(jnp.sum(mask, axis=1, keepdims=True), 1.0)
    pooled = pooled / denom

    encoded = jnp.tanh(
        jnp.dot(pooled.astype(bf16), w_enc_ref[...].astype(bf16),
                preferred_element_type=jnp.float32))     # [B, H] f32
    enc_ref[...] = encoded

    # Decoder hidden states, flattened to [B*T, H] and emitted in bf16 so the
    # tiled vocab matmul reads MXU-ready operands (halves the HBM hop).
    dh = jnp.dot(encoded.astype(bf16), wdh_ref[...].astype(bf16),
                 preferred_element_type=jnp.float32)     # [B, H]
    h = jnp.tanh(dh[:, None, :] + pos_ref[...][None, :, :])  # [B, T, H] f32
    B, T, H = h.shape
    hflat_ref[...] = h.reshape(B * T, H).astype(bf16)

    # Discriminator: one stacked pass over [encoded ; prior] — weights loaded
    # into VMEM once, shared by both "real" and "prior" inputs.
    z = jnp.concatenate([encoded, prior_ref[...]], axis=0)        # [2B, H]
    h1 = _selu(jnp.dot(z.astype(bf16), w1_ref[...].astype(bf16),
                       preferred_element_type=jnp.float32))
    h2 = _selu(jnp.dot(h1.astype(bf16), w2_ref[...].astype(bf16),
                       preferred_element_type=jnp.float32))
    # Final Linear(H, 1) as VPU multiply + lane reduce (w3 passed as [1, H]).
    logit = jnp.sum(h2 * w3_ref[...], axis=-1, keepdims=True) + b3_ref[...]
    disc_ref[...] = 1.0 / (1.0 + jnp.exp(-logit))                 # [2B, 1]


def pallas_encode_disc(emb, mask, w_enc, pos_emb, w_dec_h, prior,
                       w1, w2, w3_row, b3):
    B, S, E = emb.shape
    H = w_enc.shape[1]
    T = pos_emb.shape[0]
    return pl.pallas_call(
        encode_disc_kernel,
        out_shape=(
            jax.ShapeDtypeStruct((B, H), jnp.float32),        # encoded
            jax.ShapeDtypeStruct((B * T, H), jnp.bfloat16),   # decoder hidden
            jax.ShapeDtypeStruct((2 * B, 1), jnp.float32),    # disc([enc;prior])
        ),
        grid=(1,),
        in_specs=[
            pl.BlockSpec((B, S, E), lambda i: (0, 0, 0)),
            pl.BlockSpec((B, S), lambda i: (0, 0)),
            pl.BlockSpec((E, H), lambda i: (0, 0)),
            pl.BlockSpec((T, H), lambda i: (0, 0)),
            pl.BlockSpec((H, H), lambda i: (0, 0)),
            pl.BlockSpec((B, H), lambda i: (0, 0)),
            pl.BlockSpec((H, H), lambda i: (0, 0)),
            pl.BlockSpec((H, H), lambda i: (0, 0)),
            pl.BlockSpec((1, H), lambda i: (0, 0)),
            pl.BlockSpec((1, 1), lambda i: (0, 0)),
        ],
        out_specs=(
            pl.BlockSpec((B, H), lambda i: (0, 0)),
            pl.BlockSpec((B * T, H), lambda i: (0, 0)),
            pl.BlockSpec((2 * B, 1), lambda i: (0, 0)),
        ),
    )(emb, mask, w_enc, pos_emb, w_dec_h, prior, w1, w2, w3_row, b3)


# ---------------------------------------------------------------------------
# Kernel 2: decoder vocab projection — one flat [B*T, H] @ [H, V] matmul,
# tiled over (rows, vocab) with lane-dense (multiple-of-128) output blocks.
# ---------------------------------------------------------------------------
def decode_proj_kernel(h_ref, w_ref, b_ref, o_ref):
    o_ref[...] = (jnp.dot(h_ref[...],                       # bf16 already
                          w_ref[...].astype(jnp.bfloat16),
                          preferred_element_type=jnp.float32)
                  + b_ref[...])


def pallas_decode_proj(h_flat, w_out, b_out, tm=256, tn=128):
    # NOTE(v7x): for large H/V keep tn <= ~1024 so double-buffered (H,tn)
    # weight blocks + (tm,tn) f32 output fit the 64 MiB VMEM with headroom.
    M, H = h_flat.shape
    V = w_out.shape[1]
    if V % tn:
        tn = V
    if M % tm or M < tm:
        tm = M
    grid = (pl.cdiv(M, tm), pl.cdiv(V, tn))
    return pl.pallas_call(
        decode_proj_kernel,
        out_shape=jax.ShapeDtypeStruct((M, V), jnp.float32),
        grid=grid,
        in_specs=[
            pl.BlockSpec((tm, H), lambda m, v: (m, 0)),
            pl.BlockSpec((H, tn), lambda m, v: (0, v)),
            pl.BlockSpec((1, tn), lambda m, v: (0, v)),
        ],
        out_specs=pl.BlockSpec((tm, tn), lambda m, v: (m, v)),
        compiler_params=pltpu.CompilerParams(
            dimension_semantics=("parallel", "parallel")),
    )(h_flat, w_out, b_out)


# ---------------------------------------------------------------------------
# Parameters (deterministic synthetic init) and the forward-pass glue
# ---------------------------------------------------------------------------
def init_params(key, vocab, embed, hidden, desired_length):
    keys = jax.random.split(key, 8)
    scale_e = 1.0 / jnp.sqrt(embed)
    scale_h = 1.0 / jnp.sqrt(hidden)
    return {
        "embedding": jax.random.normal(keys[0], (vocab, embed), jnp.float32) * 0.1,
        "w_enc": jax.random.normal(keys[1], (embed, hidden), jnp.float32) * scale_e,
        "pos_emb": jax.random.normal(keys[2], (desired_length, hidden), jnp.float32) * 0.1,
        "w_dec_h": jax.random.normal(keys[3], (hidden, hidden), jnp.float32) * scale_h,
        "w_dec_out": jax.random.normal(keys[4], (hidden, vocab), jnp.float32) * scale_h,
        "b_dec_out": jnp.zeros((1, vocab), jnp.float32),
        "disc_w1": jax.random.normal(keys[5], (hidden, hidden), jnp.float32) * scale_h,
        "disc_w2": jax.random.normal(keys[6], (hidden, hidden), jnp.float32) * scale_h,
        "disc_w3": jax.random.normal(keys[7], (hidden, 1), jnp.float32) * scale_h,
        "disc_b3": jnp.zeros((1, 1), jnp.float32),
    }


def autoencoder_forward(params, x, lengths, prior_key, adversarial=True):
    """Eval-mode forward (matches the module's else-branches: no denoising,
    no gaussian noise, no teacher forcing, non-variational)."""
    B, S = x.shape
    H = params["w_enc"].shape[1]
    T = params["pos_emb"].shape[0]
    V = params["w_dec_out"].shape[1]

    # Glue: embedding gather + length mask in plain JAX.
    # (Fusing the gather via PrefetchScalarGridSpec only pays off for large S*E.)
    emb = jnp.take(params["embedding"], x, axis=0)                 # [B, S, E]
    mask = (jnp.arange(S)[None, :] < lengths[:, None]).astype(jnp.float32)
    prior = jax.random.normal(prior_key, (B, H), jnp.float32)      # torch.randn_like
    w3_row = params["disc_w3"].T                                   # [1, H]

    encoded, h_flat, d_stacked = pallas_encode_disc(
        emb, mask, params["w_enc"], params["pos_emb"], params["w_dec_h"],
        prior, params["disc_w1"], params["disc_w2"], w3_row, params["disc_b3"])

    logits_flat = pallas_decode_proj(h_flat, params["w_dec_out"],
                                     params["b_dec_out"])          # [B*T, V]
    decoded_pred = logits_flat.reshape(B, T, V)

    if adversarial:
        d_enc = d_stacked[:B]
        d_prior = d_stacked[B:]
        # detach().clone() is value-identical in the forward pass, so the
        # "detached" discriminator output aliases the real one (no extra pass).
        d_enc_det = d_enc
        return decoded_pred, d_enc, d_enc_det, d_prior, encoded
    return decoded_pred, encoded

# TODO(synk): denoising (noisy token dropout), variational reparameterization and
# teacher-forcing decode depend on injected encoder/decoder internals not defined
# in this module; only the eval-mode adversarial path is implemented.


if __name__ == "__main__":
    # Small but (8,128)-tile-aligned shapes: H=E=128, V=256, B=T=8, S=8.
    B, S, V, E, H, T = 8, 8, 256, 128, 128, 8

    key = jax.random.PRNGKey(0)
    k_params, k_tokens, k_lens, k_prior = jax.random.split(key, 4)

    params = init_params(k_params, vocab=V, embed=E, hidden=H, desired_length=T)
    x = jax.random.randint(k_tokens, (B, S), 1, V, dtype=jnp.int32)
    lengths = jax.random.randint(k_lens, (B,), 3, S + 1, dtype=jnp.int32)

    fwd = jax.jit(autoencoder_forward, static_argnames=("adversarial",))
    outs = fwd(params, x, lengths, k_prior, adversarial=True)
    outs = jax.block_until_ready(outs)

    decoded_pred, d_enc, d_enc_det, d_prior, encoded = outs
    assert decoded_pred.shape == (B, T, V)
    assert d_enc.shape == (B, 1) and d_enc_det.shape == (B, 1) and d_prior.shape == (B, 1)
    assert encoded.shape == (B, H)
    assert bool(jnp.all(jnp.isfinite(decoded_pred)))
    assert bool(jnp.all((d_enc >= 0) & (d_enc <= 1)))
    assert bool(jnp.all((d_prior >= 0) & (d_prior <= 1)))

    print("KERNEL_OK")
</pallas_src>

<mosaic_0001>
module attributes {stable_mosaic.version = 11 : i64} {
  func.func @decode_proj_kernel(%arg0: i32, %arg1: i32, %arg2: memref<64x128xbf16, #tpu.memory_space<vmem>>, %arg3: memref<128x128xf32, #tpu.memory_space<vmem>>, %arg4: memref<1x128xf32, #tpu.memory_space<vmem>>, %arg5: memref<64x128xf32, #tpu.memory_space<vmem>>) attributes {dimension_semantics = [#tpu.dimension_semantics<parallel>, #tpu.dimension_semantics<parallel>], iteration_bounds = array<i64: 1, 2>, scalar_prefetch = 0 : i64, scratch_operands = 0 : i64, tpu.core_type = #tpu.core_type<tc>, window_params = [{transform_indices = @transform_0, window_bounds = array<i64: 64, 128>}, {transform_indices = @transform_1, window_bounds = array<i64: 128, 128>}, {transform_indices = @transform_2, window_bounds = array<i64: 1, 128>}, {transform_indices = @transform_3, window_bounds = array<i64: 64, 128>}]} {
    %c0 = arith.constant 0 : index
    %c0_0 = arith.constant 0 : index
    %0 = vector.load %arg2[%c0, %c0_0] : memref<64x128xbf16, #tpu.memory_space<vmem>>, vector<64x128xbf16>
    %c0_1 = arith.constant 0 : index
    %c0_2 = arith.constant 0 : index
    %1 = vector.load %arg3[%c0_1, %c0_2] : memref<128x128xf32, #tpu.memory_space<vmem>>, vector<128x128xf32>
    %2 = arith.truncf %1 : vector<128x128xf32> to vector<128x128xbf16>
    %cst = arith.constant dense<0.000000e+00> : vector<64x128xf32>
    %3 = tpu.matmul %0, %2, %cst {dimension_numbers = #tpu.dot_dimension_numbers<[1], [0], [0], [1], [0, 0, 1, 1], [], []>} : vector<64x128xbf16>, vector<128x128xbf16>, vector<64x128xf32> -> vector<64x128xf32>
    %c0_3 = arith.constant 0 : index
    %c0_4 = arith.constant 0 : index
    %4 = vector.load %arg4[%c0_3, %c0_4] : memref<1x128xf32, #tpu.memory_space<vmem>>, vector<1x128xf32>
    %5 = vector.broadcast %4 : vector<1x128xf32> to vector<64x128xf32>
    %6 = arith.addf %3, %5 : vector<64x128xf32>
    %c0_5 = arith.constant 0 : index
    %c0_6 = arith.constant 0 : index
    %7 = vector.load %arg5[%c0_5, %c0_6] : memref<64x128xf32, #tpu.memory_space<vmem>>, vector<64x128xf32>
    tpu.vector_store %arg5[%c0_5, %c0_6], %6 {strides = array<i32>} : memref<64x128xf32, #tpu.memory_space<vmem>>, vector<64x128xf32>,
    return
  }
  func.func @transform_0(%arg0: i32, %arg1: i32) -> (i32, i32) {
    %c0_i32 = arith.constant 0 : i32
    %c0_i32_0 = arith.constant 0 : i32
    return %arg0, %c0_i32 : i32, i32
  }
  func.func @transform_1(%arg0: i32, %arg1: i32) -> (i32, i32) {
    %c0_i32 = arith.constant 0 : i32
    %c0_i32_0 = arith.constant 0 : i32
    return %c0_i32, %arg1 : i32, i32
  }
  func.func @transform_2(%arg0: i32, %arg1: i32) -> (i32, i32) {
    %c0_i32 = arith.constant 0 : i32
    %c0_i32_0 = arith.constant 0 : i32
    return %c0_i32, %arg1 : i32, i32
  }
  func.func @transform_3(%arg0: i32, %arg1: i32) -> (i32, i32) {
    %c0_i32 = arith.constant 0 : i32
    return %arg0, %arg1 : i32, i32
  }
}

module attributes {stable_mosaic.version = 11 : i64} {
  func.func @encode_disc_kernel(%arg0: i32, %arg1: memref<8x8x128xf32, #tpu.memory_space<vmem>>, %arg2: memref<8x8xf32, #tpu.memory_space<vmem>>, %arg3: memref<128x128xf32, #tpu.memory_space<vmem>>, %arg4: memref<8x128xf32, #tpu.memory_space<vmem>>, %arg5: memref<128x128xf32, #tpu.memory_space<vmem>>, %arg6: memref<8x128xf32, #tpu.memory_space<vmem>>, %arg7: memref<128x128xf32, #tpu.memory_space<vmem>>, %arg8: memref<128x128xf32, #tpu.memory_space<vmem>>, %arg9: memref<1x128xf32, #tpu.memory_space<vmem>>, %arg10: memref<1x1xf32, #tpu.memory_space<vmem>>, %arg11: memref<8x128xf32, #tpu.memory_space<vmem>>, %arg12: memref<64x128xbf16, #tpu.memory_space<vmem>>, %arg13: memref<16x1xf32, #tpu.memory_space<vmem>>) attributes {dimension_semantics = [#tpu.dimension_semantics<arbitrary>], iteration_bounds = array<i64: 1>, scalar_prefetch = 0 : i64, scratch_operands = 0 : i64, tpu.core_type = #tpu.core_type<tc>, window_params = [{pipeline_mode = #tpu.pipeline_mode<synchronous>, transform_indices = @transform_0, window_bounds = array<i64: 8, 8, 128>}, {pipeline_mode = #tpu.pipeline_mode<synchronous>, transform_indices = @transform_1, window_bounds = array<i64: 8, 8>}, {pipeline_mode = #tpu.pipeline_mode<synchronous>, transform_indices = @transform_2, window_bounds = array<i64: 128, 128>}, {pipeline_mode = #tpu.pipeline_mode<synchronous>, transform_indices = @transform_3, window_bounds = array<i64: 8, 128>}, {pipeline_mode = #tpu.pipeline_mode<synchronous>, transform_indices = @transform_4, window_bounds = array<i64: 128, 128>}, {pipeline_mode = #tpu.pipeline_mode<synchronous>, transform_indices = @transform_5, window_bounds = array<i64: 8, 128>}, {pipeline_mode = #tpu.pipeline_mode<synchronous>, transform_indices = @transform_6, window_bounds = array<i64: 128, 128>}, {pipeline_mode = #tpu.pipeline_mode<synchronous>, transform_indices = @transform_7, window_bounds = array<i64: 128, 128>}, {pipeline_mode = #tpu.pipeline_mode<synchronous>, transform_indices = @transform_8, window_bounds = array<i64: 1, 128>}, {pipeline_mode = #tpu.pipeline_mode<synchronous>, transform_indices = @transform_9, window_bounds = array<i64: 1, 1>}, {pipeline_mode = #tpu.pipeline_mode<synchronous>, transform_indices = @transform_10, window_bounds = array<i64: 8, 128>}, {pipeline_mode = #tpu.pipeline_mode<synchronous>, transform_indices = @transform_11, window_bounds = array<i64: 64, 128>}, {pipeline_mode = #tpu.pipeline_mode<synchronous>, transform_indices = @transform_12, window_bounds = array<i64: 16, 1>}]} {
    %c0 = arith.constant 0 : index
    %c0_0 = arith.constant 0 : index
    %c0_1 = arith.constant 0 : index
    %0 = vector.load %arg1[%c0, %c0_0, %c0_1] : memref<8x8x128xf32, #tpu.memory_space<vmem>>, vector<8x8x128xf32>
    %c0_2 = arith.constant 0 : index
    %c0_3 = arith.constant 0 : index
    %1 = vector.load %arg2[%c0_2, %c0_3] : memref<8x8xf32, #tpu.memory_space<vmem>>, vector<8x8xf32>
    %2 = vector.shape_cast %1 : vector<8x8xf32> to vector<8x8x1xf32>
    %3 = vector.broadcast %2 : vector<8x8x1xf32> to vector<8x8x128xf32>
    %4 = arith.mulf %0, %3 : vector<8x8x128xf32>
    %cst = arith.constant dense<0.000000e+00> : vector<8x128xf32>
    %5 = vector.multi_reduction <add>, %4, %cst [1] : vector<8x8x128xf32> to vector<8x128xf32>
    %cst_4 = arith.constant dense<0.000000e+00> : vector<8xf32>
    %6 = vector.multi_reduction <add>, %1, %cst_4 [1] : vector<8x8xf32> to vector<8xf32>
    %7 = vector.shape_cast %6 : vector<8xf32> to vector<8x1xf32>
    %cst_5 = arith.constant 1.000000e+00 : f32
    %8 = vector.broadcast %cst_5 : f32 to vector<8x1xf32>
    %9 = arith.maximumf %7, %8 : vector<8x1xf32>
    %10 = vector.broadcast %9 : vector<8x1xf32> to vector<8x128xf32>
    %11 = arith.divf %5, %10 : vector<8x128xf32>
    %12 = arith.truncf %11 : vector<8x128xf32> to vector<8x128xbf16>
    %c0_6 = arith.constant 0 : index
    %c0_7 = arith.constant 0 : index
    %13 = vector.load %arg3[%c0_6, %c0_7] : memref<128x128xf32, #tpu.memory_space<vmem>>, vector<128x128xf32>
    %14 = arith.truncf %13 : vector<128x128xf32> to vector<128x128xbf16>
    %cst_8 = arith.constant dense<0.000000e+00> : vector<8x128xf32>
    %15 = tpu.matmul %12, %14, %cst_8 {dimension_numbers = #tpu.dot_dimension_numbers<[1], [0], [0], [1], [0, 0, 1, 1], [], []>} : vector<8x128xbf16>, vector<128x128xbf16>, vector<8x128xf32> -> vector<8x128xf32>
    %16 = math.tanh %15 : vector<8x128xf32>
    %c0_9 = arith.constant 0 : index
    %c0_10 = arith.constant 0 : index
    %17 = vector.load %arg11[%c0_9, %c0_10] : memref<8x128xf32, #tpu.memory_space<vmem>>, vector<8x128xf32>
    tpu.vector_store %arg11[%c0_9, %c0_10], %16 {strides = array<i32>} : memref<8x128xf32, #tpu.memory_space<vmem>>, vector<8x128xf32>,
    %18 = arith.truncf %16 : vector<8x128xf32> to vector<8x128xbf16>
    %c0_11 = arith.constant 0 : index
    %c0_12 = arith.constant 0 : index
    %19 = vector.load %arg5[%c0_11, %c0_12] : memref<128x128xf32, #tpu.memory_space<vmem>>, vector<128x128xf32>
    %20 = arith.truncf %19 : vector<128x128xf32> to vector<128x128xbf16>
    %cst_13 = arith.constant dense<0.000000e+00> : vector<8x128xf32>
    %21 = tpu.matmul %18, %20, %cst_13 {dimension_numbers = #tpu.dot_dimension_numbers<[1], [0], [0], [1], [0, 0, 1, 1], [], []>} : vector<8x128xbf16>, vector<128x128xbf16>, vector<8x128xf32> -> vector<8x128xf32>
    %22 = vector.shape_cast %21 : vector<8x128xf32> to vector<8x1x128xf32>
    %c0_14 = arith.constant 0 : index
    %c0_15 = arith.constant 0 : index
    %23 = vector.load %arg4[%c0_14, %c0_15] : memref<8x128xf32, #tpu.memory_space<vmem>>, vector<8x128xf32>
    %24 = vector.shape_cast %23 : vector<8x128xf32> to vector<1x8x128xf32>
    %25 = vector.broadcast %22 : vector<8x1x128xf32> to vector<8x8x128xf32>
    %26 = vector.broadcast %24 : vector<1x8x128xf32> to vector<8x8x128xf32>
    %27 = arith.addf %25, %26 : vector<8x8x128xf32>
    %28 = math.tanh %27 : vector<8x8x128xf32>
    %29 = vector.shape_cast %28 : vector<8x8x128xf32> to vector<64x128xf32>
    %30 = arith.truncf %29 : vector<64x128xf32> to vector<64x128xbf16>
    %c0_16 = arith.constant 0 : index
    %c0_17 = arith.constant 0 : index
    %31 = vector.load %arg12[%c0_16, %c0_17] : memref<64x128xbf16, #tpu.memory_space<vmem>>, vector<64x128xbf16>
    tpu.vector_store %arg12[%c0_16, %c0_17], %30 {strides = array<i32>} : memref<64x128xbf16, #tpu.memory_space<vmem>>, vector<64x128xbf16>,
    %c0_18 = arith.constant 0 : index
    %c0_19 = arith.constant 0 : index
    %32 = vector.load %arg6[%c0_18, %c0_19] : memref<8x128xf32, #tpu.memory_space<vmem>>, vector<8x128xf32>
    %33 = tpu.concatenate %16, %32 in 0 : vector<8x128xf32>, vector<8x128xf32> -> vector<16x128xf32>
    %34 = arith.truncf %33 : vector<16x128xf32> to vector<16x128xbf16>
    %c0_20 = arith.constant 0 : index
    %c0_21 = arith.constant 0 : index
    %35 = vector.load %arg7[%c0_20, %c0_21] : memref<128x128xf32, #tpu.memory_space<vmem>>, vector<128x128xf32>
    %36 = arith.truncf %35 : vector<128x128xf32> to vector<128x128xbf16>
    %cst_22 = arith.constant dense<0.000000e+00> : vector<16x128xf32>
    %37 = tpu.matmul %34, %36, %cst_22 {dimension_numbers = #tpu.dot_dimension_numbers<[1], [0], [0], [1], [0, 0, 1, 1], [], []>} : vector<16x128xbf16>, vector<128x128xbf16>, vector<16x128xf32> -> vector<16x128xf32>
    %cst_23 = arith.constant 0.000000e+00 : f32
    %38 = vector.broadcast %cst_23 : f32 to vector<16x128xf32>
    %39 = arith.cmpf ogt, %37, %38 : vector<16x128xf32>
    %40 = math.exp %37 : vector<16x128xf32>
    %cst_24 = arith.constant 1.000000e+00 : f32
    %41 = vector.broadcast %cst_24 : f32 to vector<16x128xf32>
    %42 = arith.subf %40, %41 : vector<16x128xf32>
    %cst_25 = arith.constant 1.67326319 : f32
    %43 = vector.broadcast %cst_25 : f32 to vector<16x128xf32>
    %44 = arith.mulf %43, %42 : vector<16x128xf32>
    %45 = arith.select %39, %37, %44 : vector<16x128xi1>, vector<16x128xf32>
    %cst_26 = arith.constant 1.05070102 : f32
    %46 = vector.broadcast %cst_26 : f32 to vector<16x128xf32>
    %47 = arith.mulf %46, %45 : vector<16x128xf32>
    %48 = arith.truncf %47 : vector<16x128xf32> to vector<16x128xbf16>
    %c0_27 = arith.constant 0 : index
    %c0_28 = arith.constant 0 : index
    %49 = vector.load %arg8[%c0_27, %c0_28] : memref<128x128xf32, #tpu.memory_space<vmem>>, vector<128x128xf32>
    %50 = arith.truncf %49 : vector<128x128xf32> to vector<128x128xbf16>
    %cst_29 = arith.constant dense<0.000000e+00> : vector<16x128xf32>
    %51 = tpu.matmul %48, %50, %cst_29 {dimension_numbers = #tpu.dot_dimension_numbers<[1], [0], [0], [1], [0, 0, 1, 1], [], []>} : vector<16x128xbf16>, vector<128x128xbf16>, vector<16x128xf32> -> vector<16x128xf32>
    %cst_30 = arith.constant 0.000000e+00 : f32
    %52 = vector.broadcast %cst_30 : f32 to vector<16x128xf32>
    %53 = arith.cmpf ogt, %51, %52 : vector<16x128xf32>
    %54 = math.exp %51 : vector<16x128xf32>
    %cst_31 = arith.constant 1.000000e+00 : f32
    %55 = vector.broadcast %cst_31 : f32 to vector<16x128xf32>
    %56 = arith.subf %54, %55 : vector<16x128xf32>
    %cst_32 = arith.constant 1.67326319 : f32
    %57 = vector.broadcast %cst_32 : f32 to vector<16x128xf32>
    %58 = arith.mulf %57, %56 : vector<16x128xf32>
    %59 = arith.select %53, %51, %58 : vector<16x128xi1>, vector<16x128xf32>
    %cst_33 = arith.constant 1.05070102 : f32
    %60 = vector.broadcast %cst_33 : f32 to vector<16x128xf32>
    %61 = arith.mulf %60, %59 : vector<16x128xf32>
    %c0_34 = arith.constant 0 : index
    %c0_35 = arith.constant 0 : index
    %62 = vector.load %arg9[%c0_34, %c0_35] : memref<1x128xf32, #tpu.memory_space<vmem>>, vector<1x128xf32>
    %63 = vector.broadcast %62 : vector<1x128xf32> to vector<16x128xf32>
    %64 = arith.mulf %61, %63 : vector<16x128xf32>
    %cst_36 = arith.constant dense<0.000000e+00> : vector<16xf32>
    %65 = vector.multi_reduction <add>, %64, %cst_36 [1] : vector<16x128xf32> to vector<16xf32>
    %66 = vector.shape_cast %65 : vector<16xf32> to vector<16x1xf32>
    %c0_37 = arith.constant 0 : index
    %c0_38 = arith.constant 0 : index
    %67 = vector.load %arg10[%c0_37, %c0_38] : memref<1x1xf32, #tpu.memory_space<vmem>>, vector<1x1xf32>
    %68 = vector.broadcast %67 : vector<1x1xf32> to vector<16x1xf32>
    %69 = arith.addf %66, %68 : vector<16x1xf32>
    %cst_39 = arith.constant 0.000000e+00 : f32
    %70 = vector.broadcast %cst_39 : f32 to vector<16x1xf32>
    %71 = arith.subf %70, %69 : vector<16x1xf32>
    %72 = math.exp %71 : vector<16x1xf32>
    %cst_40 = arith.constant 1.000000e+00 : f32
    %73 = vector.broadcast %cst_40 : f32 to vector<16x1xf32>
    %74 = arith.addf %73, %72 : vector<16x1xf32>
    %cst_41 = arith.constant 1.000000e+00 : f32
    %75 = vector.broadcast %cst_41 : f32 to vector<16x1xf32>
    %76 = arith.divf %75, %74 : vector<16x1xf32>
    %c0_42 = arith.constant 0 : index
    %c0_43 = arith.constant 0 : index
    %77 = vector.load %arg13[%c0_42, %c0_43] : memref<16x1xf32, #tpu.memory_space<vmem>>, vector<16x1xf32>
    tpu.vector_store %arg13[%c0_42, %c0_43], %76 {strides = array<i32>} : memref<16x1xf32, #tpu.memory_space<vmem>>, vector<16x1xf32>,
    return
  }
  func.func @transform_0(%arg0: i32) -> (i32, i32, i32) {
    %c0_i32 = arith.constant 0 : i32
    %c0_i32_0 = arith.constant 0 : i32
    %c0_i32_1 = arith.constant 0 : i32
    %c0_i32_2 = arith.constant 0 : i32
    return %c0_i32, %c0_i32_0, %c0_i32_1 : i32, i32, i32
  }
  func.func @transform_1(%arg0: i32) -> (i32, i32) {
    %c0_i32 = arith.constant 0 : i32
    %c0_i32_0 = arith.constant 0 : i32
    %c0_i32_1 = arith.constant 0 : i32
    return %c0_i32, %c0_i32_0 : i32, i32
  }
  func.func @transform_2(%arg0: i32) -> (i32, i32) {
    %c0_i32 = arith.constant 0 : i32
    %c0_i32_0 = arith.constant 0 : i32
    %c0_i32_1 = arith.constant 0 : i32
    return %c0_i32, %c0_i32_0 : i32, i32
  }
  func.func @transform_3(%arg0: i32) -> (i32, i32) {
    %c0_i32 = arith.constant 0 : i32
    %c0_i32_0 = arith.constant 0 : i32
    %c0_i32_1 = arith.constant 0 : i32
    return %c0_i32, %c0_i32_0 : i32, i32
  }
  func.func @transform_4(%arg0: i32) -> (i32, i32) {
    %c0_i32 = arith.constant 0 : i32
    %c0_i32_0 = arith.constant 0 : i32
    %c0_i32_1 = arith.constant 0 : i32
    return %c0_i32, %c0_i32_0 : i32, i32
  }
  func.func @transform_5(%arg0: i32) -> (i32, i32) {
    %c0_i32 = arith.constant 0 : i32
    %c0_i32_0 = arith.constant 0 : i32
    %c0_i32_1 = arith.constant 0 : i32
    return %c0_i32, %c0_i32_0 : i32, i32
  }
  func.func @transform_6(%arg0: i32) -> (i32, i32) {
    %c0_i32 = arith.constant 0 : i32
    %c0_i32_0 = arith.constant 0 : i32
    %c0_i32_1 = arith.constant 0 : i32
    return %c0_i32, %c0_i32_0 : i32, i32
  }
  func.func @transform_7(%arg0: i32) -> (i32, i32) {
    %c0_i32 = arith.constant 0 : i32
    %c0_i32_0 = arith.constant 0 : i32
    %c0_i32_1 = arith.constant 0 : i32
    return %c0_i32, %c0_i32_0 : i32, i32
  }
  func.func @transform_8(%arg0: i32) -> (i32, i32) {
    %c0_i32 = arith.constant 0 : i32
    %c0_i32_0 = arith.constant 0 : i32
    %c0_i32_1 = arith.constant 0 : i32
    return %c0_i32, %c0_i32_0 : i32, i32
  }
  func.func @transform_9(%arg0: i32) -> (i32, i32) {
    %c0_i32 = arith.constant 0 : i32
    %c0_i32_0 = arith.constant 0 : i32
    %c0_i32_1 = arith.constant 0 : i32
    return %c0_i32, %c0_i32_0 : i32, i32
  }
  func.func @transform_10(%arg0: i32) -> (i32, i32) {
    %c0_i32 = arith.constant 0 : i32
    %c0_i32_0 = arith.constant 0 : i32
    %c0_i32_1 = arith.constant 0 : i32
    return %c0_i32, %c0_i32_0 : i32, i32
  }
  func.func @transform_11(%arg0: i32) -> (i32, i32) {
    %c0_i32 = arith.constant 0 : i32
    %c0_i32_0 = arith.constant 0 : i32
    %c0_i32_1 = arith.constant 0 : i32
    return %c0_i32, %c0_i32_0 : i32, i32
  }
  func.func @transform_12(%arg0: i32) -> (i32, i32) {
    %c0_i32 = arith.constant 0 : i32
    %c0_i32_0 = arith.constant 0 : i32
    %c0_i32_1 = arith.constant 0 : i32
    return %c0_i32, %c0_i32_0 : i32, i32
  }
}

</mosaic_0001>

<bundles_post_ra>
// kernel: autoencoder_forward.3
= control target key start
LH: loop header
LB: loop body
LE: loop exit
PB: predicated region body
PF: predicated region fallthrough
CT: control target
= control target key end

     0   :  { %8 = vsyncpa [#allocation4], 0  ;;  %s983_s0 = inlined_call_operand.vmem [shape: bf16[64,128], index: 0, kind: input, shape index: {}]   ;;  %s984_s1 = inlined_call_operand.vmem [shape: f32[128,256], index: 1, kind: input, shape index: {}]   ;;  %s985_s2 = inlined_call_operand.vmem [shape: f32[1,256], index: 2, kind: input, shape index: {}]   ;;  %s986_s3 = inlined_call_operand.hbm [shape: f32[64,256], index: 3, kind: output, shape index: {}]  }
   0x1   :  { %10 = vsyncpa [#allocation4 + $0x1], 0  ;;  %s806_s12 = smov 0   ;;  %s808_s13 = smov 0  }
   0x2   :  { %s810_s14 = smov 0   ;;  %s812_s15 = smov 0  }
   0x3   :  { %s814_s16 = smov 0   ;;  %s816_s17 = smov 0  }
   0x4 LB: > { %s569_s18 = sadd.s32 4294967295, %s780_s17   ;;  %s570_s19 = sadd.s32 4294967294, %s780_s17   ;;  %s780_s17 = sphi %s816_s17, %s16_s17   ;;  %s776_s16 = sphi %s814_s16, %s993_s16   ;;  %s772_s15 = sphi %s812_s15, %s992_s15   ;;  %s768_s14 = sphi %s810_s14, %s991_s14   ;;  %s764_s13 = sphi %s808_s13, %s990_s13   ;;  %s760_s12 = sphi %s806_s12, %s989_s12  }
   0x5   : > { %s25_s20 = sadd.s32 1, %s776_s16  ;;  %s61_s21 = sadd.s32 1, %s768_s14 }
   0x6   : > { %p26_p0 = scmp.ge.s32.totalorder %s25_s20, 2  ;;  %p68_p1 = scmp.ne.s32.totalorder %s768_s14, %s764_s13 }
   0x7   : > { %p69_p2 = scmp.eq.s32.totalorder %s780_s17, 0  ;;  %p126_p3 = scmp.eq.s32.totalorder %s569_s18, 1 }
   0x8   : > { %s995_s20 = smov (%p26_p0, %s25_s20), 0  ;;  %p131_p6 = scmp.ne.s32.totalorder %s764_s13, %s760_s12 }
   0x9   : > { %p70_p4 = por %p69_p2, %p68_p1  ;;  %p845_p5 = por %p126_p3, %p68_p1 }
   0xa   : > { %s58_s23 = ssub.s32 %s776_s16, %s995_s20  ;;  %p132_p8 = scmp.eq.s32.totalorder %s570_s19, 1 }
   0xb   : > { %p59_p7 = scmp.eq.s32.totalorder %s58_s23, 0  ;;  %p573_p10 = scmp.ge.s32.totalorder %s780_s17, 2 }
   0xc   : > { %p856_p9 = por %p132_p8, %p131_p6 }
   0xd   : > { %s854_s24 = scalar_select %p59_p7, %s768_s14, %s61_s21  }
   0xe   : > { %157 = sbr.rel (%p573_p10) target bundleno = 33 (0x21), region = 20 }
  0x15   : > { %160 = sbr.rel (!%p70_p4) target bundleno = 33 (0x21), region = 24  ;;  %s162_s26 = sand.u32 (%p70_p4), 1, %s768_s14  }
  0x16   : > { %s575_s27 = sshll.u32 (%p70_p4), %s776_s16, 3  ;;  %s574_s28 = sshll.u32 (%p70_p4), %s162_s26, 7 }
  0x17   : > { %s868_s4 = scalar_lea.vmem (%p70_p4), %s984_s1, %s575_s27  ;;  %s164_s5 = scalar_lea.vmem (%p70_p4), [#allocation2], %s574_s28 }
  0x18   : > { %v224_v0 = vld [vmem:[%s868_s4] sm:$0xff] (%p70_p4)  ;;  %v226_v1 = vld [vmem:[%s868_s4 + $0x10] sm:$0xff] (%p70_p4) }
  0x19   : > { %v228_v2 = vld [vmem:[%s868_s4 + $0x20] sm:$0xff] (%p70_p4)  ;;  %225 = vst [vmem:[%s164_s5] sm:$0xff] (%p70_p4), %v224_v0  ;;  %227 = vst [vmem:[%s164_s5 + $0x8] sm:$0xff] (%p70_p4), %v226_v1  ;;  %v230_v3 = vld [vmem:[%s868_s4 + $0x30] sm:$0xff] (%p70_p4) }
  0x1a   : > { %229 = vst [vmem:[%s164_s5 + $0x10] sm:$0xff] (%p70_p4), %v228_v2  ;;  %v232_v4 = vld [vmem:[%s868_s4 + $0x40] sm:$0xff] (%p70_p4)  ;;  %v234_v5 = vld [vmem:[%s868_s4 + $0x50] sm:$0xff] (%p70_p4)  ;;  %231 = vst [vmem:[%s164_s5 + $0x18] sm:$0xff] (%p70_p4), %v230_v3 }
  0x1b   : > { %233 = vst [vmem:[%s164_s5 + $0x20] sm:$0xff] (%p70_p4), %v232_v4  ;;  %235 = vst [vmem:[%s164_s5 + $0x28] sm:$0xff] (%p70_p4), %v234_v5  ;;  %v236_v6 = vld [vmem:[%s868_s4 + $0x60] sm:$0xff] (%p70_p4)  ;;  %v238_v7 = vld [vmem:[%s868_s4 + $0x70] sm:$0xff] (%p70_p4) }
  0x1c   : > { %v240_v8 = vld [vmem:[%s868_s4 + $0x80] sm:$0xff]  ;;  %237 = vst [vmem:[%s164_s5 + $0x30] sm:$0xff] %v236_v6  ;;  %239 = vst [vmem:[%s164_s5 + $0x38] sm:$0xff] %v238_v7  ;;  %v242_v9 = vld [vmem:[%s868_s4 + $0x90] sm:$0xff] }
  0x1d   : > { %241 = vst [vmem:[%s164_s5 + $0x40] sm:$0xff] %v240_v8  ;;  %v244_v10 = vld [vmem:[%s868_s4 + $0xa0] sm:$0xff]  ;;  %v246_v11 = vld [vmem:[%s868_s4 + $0xb0] sm:$0xff]  ;;  %243 = vst [vmem:[%s164_s5 + $0x48] sm:$0xff] %v242_v9 }
  0x1e   : > { %245 = vst [vmem:[%s164_s5 + $0x50] sm:$0xff] %v244_v10  ;;  %247 = vst [vmem:[%s164_s5 + $0x58] sm:$0xff] %v246_v11  ;;  %v248_v12 = vld [vmem:[%s868_s4 + $0xc0] sm:$0xff]  ;;  %v250_v13 = vld [vmem:[%s868_s4 + $0xd0] sm:$0xff] }
  0x1f   : > { %v252_v14 = vld [vmem:[%s868_s4 + $0xe0] sm:$0xff]  ;;  %249 = vst [vmem:[%s164_s5 + $0x60] sm:$0xff] %v248_v12  ;;  %251 = vst [vmem:[%s164_s5 + $0x68] sm:$0xff] %v250_v13  ;;  %v254_v15 = vld [vmem:[%s868_s4 + $0xf0] sm:$0xff] }
  0x20   : > { %253 = vst [vmem:[%s164_s5 + $0x70] sm:$0xff] %v252_v14  ;;  %255 = vst [vmem:[%s164_s5 + $0x78] sm:$0xff] %v254_v15 }
  0x21 PF: > { %p576_p11 = scmp.ge.s32.totalorder %s780_s17, 1  ;;  %p266_p12 = scmp.lt.s32.totalorder %s780_s17, 3 }
  0x23   : > { %p267_p13 = pnand %p576_p11, %p266_p12 }
  0x24   : > { %s889_s6 = sand.u32 (!%p267_p13), 1, %s764_s13   ;;  %v698_v16 = vld [vmem:[%s983_s0] sm:$0xff] (!%p267_p13)   ;;  %v699_v17 = vld [vmem:[%s983_s0 + $0x10] sm:$0xff] (!%p267_p13)   ;;  %v700_v42 = vld [vmem:[%s983_s0 + $0x8] sm:$0xff] (!%p267_p13)   ;;  %p310_p0 = scmp.lt.s32.totalorder (!%p267_p13), %s772_s15, 1 }
  0x25   : > { %270 = sbr.rel (%p267_p13) target bundleno = 307 (0x133), region = 66  ;;  %s577_s9 = sshll.u32 (!%p267_p13), %s889_s6, 7  ;;  %616 = vmatprep.mubr.bf16.mxu0 (!%p267_p13), %v698_v16  ;;  %620 = vmatprep.mubr.bf16.mxu1 (!%p267_p13), %v699_v17  ;;  %v701_v43 = vld [vmem:[%s983_s0 + $0x18] sm:$0xff] (!%p267_p13)  }
  0x26   : > { %s898_s18 = scalar_lea.vmem (!%p267_p13), [#allocation2], %s577_s9  ;;  %s578_s28 = sshll.u32 (!%p267_p13), %s889_s6, 6 }
  0x27   : > { %v323_v18 = vld [vmem:[%s898_s18] sm:$0xff] (!%p267_p13)  ;;  %v324_v19 = vld [vmem:[%s898_s18 + $0x8] sm:$0xff] (!%p267_p13)  ;;  %v325_v20 = vld [vmem:[%s898_s18 + $0x10] sm:$0xff] (!%p267_p13)  ;;  %s303_s5 = scalar_lea.vmem (!%p267_p13), [#allocation3], %s578_s28  ;;  %s585_s8 = sshll.u32 (!%p267_p13), %s772_s15, 7 }
  0x28   : > { %v339_v21 = vpack.c.bf16 (!%p267_p13), %v324_v19, %v323_v18  ;;  %v326_v22 = vld [vmem:[%s898_s18 + $0x18] sm:$0xff] (!%p267_p13)  ;;  %v327_v24 = vld [vmem:[%s898_s18 + $0x20] sm:$0xff] (!%p267_p13)  ;;  %v328_v25 = vld [vmem:[%s898_s18 + $0x28] sm:$0xff] (!%p267_p13)  ;;  %s467_s7 = sshll.u32 (!%p267_p13), %s303_s5, 4  ;;  %s934_s10 = scalar_lea.hbm (!%p267_p13), %s986_s3, %s585_s8  ;;  %s929_s7 = int_to_ptr.vmem [resolvable:$true] %s467_s7 }
  0x29   : > { %v340_v23 = vpack.c.bf16 (!%p267_p13), %v326_v22, %v325_v20  ;;  %v341_v26 = vpack.c.bf16 (!%p267_p13), %v328_v25, %v327_v24  ;;  %v329_v27 = vld [vmem:[%s898_s18 + $0x30] sm:$0xff] (!%p267_p13)  ;;  %v330_v28 = vld [vmem:[%s898_s18 + $0x38] sm:$0xff] (!%p267_p13)  ;;  %v331_v30 = vld [vmem:[%s898_s18 + $0x40] sm:$0xff] (!%p267_p13)  ;;  %s452_s11 = scalar_lea.sflag (!%p267_p13), [#allocation4], %s889_s6  ;;  %s782_s19 = smov (!%p267_p13), [#allocation3]  }
  0x2a   : > { %600 = vmatprep.subr.bf16.mxu0 (!%p267_p13), %v339_v21  ;;  %624 = vmatprep.subr.bf16.mxu1 (!%p267_p13), %v339_v21  ;;  %v342_v29 = vpack.c.bf16 (!%p267_p13), %v330_v28, %v329_v27  ;;  %v332_v31 = vld [vmem:[%s898_s18 + $0x48] sm:$0xff] (!%p267_p13)  ;;  %v333_v33 = vld [vmem:[%s898_s18 + $0x50] sm:$0xff] (!%p267_p13)  ;;  %v334_v34 = vld [vmem:[%s898_s18 + $0x58] sm:$0xff] (!%p267_p13)  ;;  %s706_s21 = sshll.u32 (!%p267_p13), %s782_s19, 4  ;;  %s707_s21 = int_to_ptr.vmem [resolvable:$false] %s706_s21 }
  0x2b   : > { %601 = vmatpush3.bf16.msra.mxu0 (!%p267_p13), %v339_v21  ;;  %632 = vmatpush3.bf16.msra.mxu1 (!%p267_p13), %v339_v21  ;;  %v343_v32 = vpack.c.bf16 (!%p267_p13), %v332_v31, %v331_v30  ;;  %v344_v35 = vpack.c.bf16 (!%p267_p13), %v334_v34, %v333_v33  ;;  %v335_v36 = vld [vmem:[%s898_s18 + $0x60] sm:$0xff] (!%p267_p13)  ;;  %v336_v37 = vld [vmem:[%s898_s18 + $0x68] sm:$0xff] (!%p267_p13)  ;;  %v337_v39 = vld [vmem:[%s898_s18 + $0x70] sm:$0xff] (!%p267_p13)  ;;  %s708_s23 = scalar_lea.vmem (!%p267_p13), %s707_s21, 2048  ;;  %p709_p4 = scmp.lt.s32.totalorder (!%p267_p13), %s929_s7, %s707_s21 }
  0x2c   : > { %602 = vmatprep.subr.bf16.mxu0 %v340_v23  ;;  %625 = vmatprep.subr.bf16.mxu1 %v340_v23  ;;  %v345_v38 = vpack.c.bf16 %v336_v37, %v335_v36  ;;  %v338_v40 = vld [vmem:[%s898_s18 + $0x78] sm:$0xff]  ;;  %s311_s27 = scalar_select %p310_p0, %s772_s15, 1 }
  0x2d   : > { %v346_v41 = vpack.c.bf16 %v338_v40, %v337_v39  ;;  %s702_s18 = scalar_lea.vmem %s929_s7, 1024 }
  0x2e   : > { %s312_s4 = scalar_lea.vmem %s985_s2, %s311_s27  ;;  %p703_p1 = scmp.ne.s32.totalorder %s929_s7, %s702_s18 }
  0x2f   : > { %603 = vmatpush3.bf16.msra.mxu0 %v340_v23  ;;  %633 = vmatpush3.bf16.msra.mxu1 %v340_v23  ;;  %v579_v44 = vld [vmem:[%s312_s4] ss:$0 sm:$0xff]  ;;  %p710_p6 = scmp.lt.s32.totalorder %s708_s23, %s702_s18 }
  0x30   : > { %604 = vmatprep.subr.bf16.mxu0 %v341_v26  ;;  %626 = vmatprep.subr.bf16.mxu1 %v341_v26  ;;  %p704_p2 = pnand %p703_p1, %p845_p5 }
  0x31   : > { %p711_p7 = por %p710_p6, %p709_p4 }
  0x32   : > { %p705_p3 = pneg %p704_p2 }
  0x33   : > { %605 = vmatpush3.bf16.msra.mxu0 %v341_v26  ;;  %634 = vmatpush3.bf16.msra.mxu1 %v341_v26 }
  0x34   : > { %606 = vmatprep.subr.bf16.mxu0 %v342_v29  ;;  %627 = vmatprep.subr.bf16.mxu1 %v342_v29  ;;  %p712_p8 = pnand %p711_p7, %p705_p3 }
  0x37   : > { %607 = vmatpush3.bf16.msra.mxu0 %v342_v29  ;;  %635 = vmatpush3.bf16.msra.mxu1 %v342_v29 }
  0x38   : > { %608 = vmatprep.subr.bf16.mxu0 %v343_v32  ;;  %628 = vmatprep.subr.bf16.mxu1 %v343_v32 }
  0x3b   : > { %609 = vmatpush3.bf16.msra.mxu0 %v343_v32  ;;  %636 = vmatpush3.bf16.msra.mxu1 %v343_v32 }
  0x3c   : > { %610 = vmatprep.subr.bf16.mxu0 %v344_v35  ;;  %629 = vmatprep.subr.bf16.mxu1 %v344_v35 }
  0x3f   : > { %611 = vmatpush3.bf16.msra.mxu0 %v344_v35  ;;  %637 = vmatpush3.bf16.msra.mxu1 %v344_v35 }
  0x40   : > { %612 = vmatprep.subr.bf16.mxu0 %v345_v38  ;;  %630 = vmatprep.subr.bf16.mxu1 %v345_v38 }
  0x43   : > { %613 = vmatpush3.bf16.msra.mxu0 %v345_v38  ;;  %638 = vmatpush3.bf16.msra.mxu1 %v345_v38 }
  0x44   : > { %614 = vmatprep.subr.bf16.mxu0 %v346_v41  ;;  %631 = vmatprep.subr.bf16.mxu1 %v346_v41 }
  0x47   : > { %615 = vmatpush3.bf16.msra.mxu0 %v346_v41  ;;  %639 = vmatpush3.bf16.msra.mxu1 %v346_v41 }
  0x4a   : > { %617 = vmatmul.mubr.bf16.vlgmr.msra.gmra.mrb[0].mxu0 %v700_v42  ;;  %621 = vmatmul.mubr.bf16.vlgmr.msra.gmra.mrb[0].mxu1 %v701_v43 }
 0x11d   : > { %v618_v45 = vpop.f32.mrb[0].mxu0  ;;  %v622_v46 = vpop.f32.mrb[0].mxu1 }
 0x11e   : > { %v421_v47 = vadd.f32 %v618_v45, %v579_v44  ;;  %v437_v48 = vadd.f32 %v622_v46, %v579_v44  ;;  %v412_v49 = vpop.f32.mrb[1].mxu0  ;;  %v428_v50 = vpop.f32.mrb[1].mxu1 }
 0x11f   : > { %v413_v51 = vadd.f32 %v579_v44, %v412_v49  ;;  %v429_v52 = vadd.f32 %v579_v44, %v428_v50  ;;  %v619_v53 = vpop.f32.mrb[2].mxu0  ;;  %v623_v54 = vpop.f32.mrb[2].mxu1 }
 0x120   : > { %445 = vst [vmem:[%s303_s5 + $0x10] sm:$0xff] %v421_v47  ;;  %449 = vst [vmem:[%s303_s5 + $0x30] sm:$0xff] %v437_v48  ;;  %v424_v55 = vadd.f32 %v619_v53, %v579_v44  ;;  %v440_v56 = vadd.f32 %v623_v54, %v579_v44  ;;  %v415_v57 = vpop.f32.mrb[3].mxu0  ;;  %v431_v58 = vpop.f32.mrb[3].mxu1 }
 0x121   : > { %443 = vst [vmem:[%s303_s5] sm:$0xff] %v413_v51  ;;  %447 = vst [vmem:[%s303_s5 + $0x20] sm:$0xff] %v429_v52  ;;  %v416_v59 = vadd.f32 %v579_v44, %v415_v57  ;;  %v432_v60 = vadd.f32 %v579_v44, %v431_v58 }
 0x122   : > { %446 = vst [vmem:[%s303_s5 + $0x18] sm:$0xff] %v424_v55  ;;  %450 = vst [vmem:[%s303_s5 + $0x38] sm:$0xff] %v440_v56 }
 0x123   : > { %444 = vst [vmem:[%s303_s5 + $0x8] sm:$0xff] %v416_v59  ;;  %448 = vst [vmem:[%s303_s5 + $0x28] sm:$0xff] %v432_v60 }
 0x124   : > { %715 = shalt.err (!%p712_p8)
}
 0x125   : > { %s716_s26 = scalar_lea.hbm %s934_s10, 1024  ;;  %s720_s29 = scalar_lea.hbm %s986_s3, 2048 }
 0x126   : > { %p717_p11 = scmp.ne.s32.totalorder %s934_s10, %s716_s26  ;;  %p721_p0 = scmp.lt.u32.totalorder %s934_s10, %s986_s3 }
 0x127   : > { %p722_p1 = scmp.lt.u32.totalorder %s720_s29, %s716_s26  ;;  %p724_p3 = scmp.lt.u32.totalorder %s716_s26, %s934_s10 }
 0x128   : > { %p718_p12 = pnand %p717_p11, %p845_p5 }
 0x129   : > { %p723_p2 = por %p722_p1, %p721_p0 }
 0x12a   : > { %p719_p13 = pneg %p718_p12 }
 0x12b   : > { %p725_p4 = por %p724_p3, %p723_p2 }
 0x12d   : > { %p726_p6 = pnand %p725_p4, %p719_p13 }
 0x12f   : > { %729 = shalt.err (!%p726_p6)
}
 0x130   : > { %s783_s5 = smov 128   ;;  %s784_s8 = smov 256  }
 0x131   : > { %s785_s15 = smov 8  }
 0x132   : > { %640 = dma.vmem_to_hbm [thread:$0]  (%p845_p5), %s929_s7, 1024, %s934_s10, %s452_s11, %s783_s5, %s784_s8, %s785_s15  }
 0x133 PF: > { %s482_s9 = sand.u32 1, %s760_s12   ;;  %p643_p7 = pnand %p573_p10, %p856_p9 }
 0x134   : > { %s483_s18 = scalar_lea.sflag [#allocation4], %s482_s9 }
 0x135   : > { %755 = dma.done.wait (!%p643_p7), %s483_s18, 1024  }
 0x136   : > { %757 = vsyncadd (!%p643_p7), %s483_s18, 4294966272  ;;  %s16_s17 = sadd.s32 1, %s780_s17   ;;  %s989_s12 = smov %s764_s13 }
 0x137   : > { %p13_p8 = scmp.ge.s32.totalorder %s16_s17, 4   ;;  %s990_s13 = smov %s768_s14 }
 0x138   : > { %s991_s14 = smov %s854_s24  ;;  %s992_s15 = smov %s776_s16 }
 0x139   : > { %s993_s16 = smov %s995_s20  ;;  %15 = sbr.rel (!%p13_p8) target bundleno = 4 (0x4), region = 116 }
 0x140   :  { %488 = vsyncpa [#allocation4], 1 }
 0x141   :  { %490 = vsyncpa [#allocation4 + $0x1], 1 }

// kernel: autoencoder_forward.2
= control target key start
LH: loop header
LB: loop body
LE: loop exit
PB: predicated region body
PF: predicated region fallthrough
CT: control target
= control target key end

     0   :  { %s1376_s0 = inlined_call_operand.vmem [shape: f32[8,8,128], index: 0, kind: input, shape index: {}]   ;;  %s1377_s1 = inlined_call_operand.vmem [shape: f32[8,8], index: 1, kind: input, shape index: {}]   ;;  %s1378_s2 = inlined_call_operand.vmem [shape: f32[128,128], index: 2, kind: input, shape index: {}]   ;;  %s1379_s3 = inlined_call_operand.vmem [shape: f32[8,128], index: 3, kind: input, shape index: {}]   ;;  %s1380_s4 = inlined_call_operand.vmem [shape: f32[128,128], index: 4, kind: input, shape index: {}]   ;;  %s1381_s5 = inlined_call_operand.vmem [shape: f32[8,128], index: 5, kind: input, shape index: {}]   ;;  %s1382_s6 = inlined_call_operand.vmem [shape: f32[128,128], index: 6, kind: input, shape index: {}]   ;;  %s1383_s7 = inlined_call_operand.vmem [shape: f32[128,128], index: 7, kind: input, shape index: {}]   ;;  %s1384_s8 = inlined_call_operand.vmem [shape: f32[1,128], index: 8, kind: input, shape index: {}]   ;;  %s1385_s9 = inlined_call_operand.<no memory space> [shape: f32[1,1], index: 9, kind: input, shape index: {}]   ;;  %s1386_s10 = inlined_call_operand.hbm [shape: f32[8,128], index: 10, kind: output, shape index: {0}]   ;;  %s1387_s11 = inlined_call_operand.vmem [shape: bf16[64,128], index: 11, kind: output, shape index: {1}]   ;;  %s1388_s12 = inlined_call_operand.vmem [shape: f32[16,1], index: 12, kind: output, shape index: {2}]  }
   0x1   :  { %v18_v0 = vstv %s1385_s9 }
   0x2   :  { %19 = vst [vmem:[#allocation2] sm:$0x1] %v18_v0 }
   0x3   :  { %v50_v1 = vld [vmem:[%s1377_s1] sm:$0xff]  ;;  %vm163_vm0 = vcmask 64512   ;;  %v51_v2 = vlaneseq }
   0x4   :  { %v164_v3 = vsel %vm163_vm0, %v50_v1, 0.0 }
   0x5   :  { %20 = vsyncpa [#allocation4], 0  ;;  %165 = vadd.xlane.f32.xlu0 %v164_v3  ;;  %v1059_v4 = vshrl.u32 %v51_v2, 7  ;;  %v208_v15 = vld [vmem:[%s1378_s2] sm:$0xff]  ;;  %v209_v16 = vld [vmem:[%s1378_s2 + $0x8] sm:$0xff]  ;;  %v984_v17 = vmov 0.0  }
   0x6   :  { %826 = vmatprep.subr.bf16.mxu0 %v984_v17  ;;  %v224_v18 = vpack.c.bf16 %v209_v16, %v208_v15  ;;  %846 = vmatprep.subr.bf16.mxu1 %v984_v17  ;;  %v210_v22 = vld [vmem:[%s1378_s2 + $0x10] sm:$0xff]  ;;  %v211_v23 = vld [vmem:[%s1378_s2 + $0x18] sm:$0xff]  ;;  %v212_v27 = vld [vmem:[%s1378_s2 + $0x20] sm:$0xff]  ;;  %vm985_vm1 = vmmov 0   ;;  %vm249_vm2 = vcmask 1041409   ;;  %vm252_vm3 = vcmask 1042434  }
   0x7   :  { %v67_v5 = vsub.s32 2, %v1059_v4  ;;  %v1063_v6 = vsub.s32 0, %v1059_v4  ;;  %v74_v9 = vsub.s32 3, %v1059_v4  ;;  %v81_v11 = vsub.s32 4, %v1059_v4  ;;  %v213_v28 = vld [vmem:[%s1378_s2 + $0x28] sm:$0xff]  ;;  %v214_v31 = vld [vmem:[%s1378_s2 + $0x30] sm:$0xff]  ;;  %842 = vmatprep.mubr.msk.bf16.mxu0 %vm985_vm1, %v984_v17  ;;  %862 = vmatprep.mubr.msk.bf16.mxu1 %vm985_vm1, %v984_v17 }
   0x8   :  { %v88_v13 = vsub.s32 5, %v1059_v4  ;;  %v60_v14 = vsub.s32 1, %v1059_v4  ;;  %v95_v20 = vsub.s32 6, %v1059_v4  ;;  %827 = vmatpush3.bf16.msra.mxu0 %v224_v18  ;;  %v225_v24 = vpack.c.bf16 %v211_v23, %v210_v22  ;;  %v215_v32 = vld [vmem:[%s1378_s2 + $0x38] sm:$0xff]  ;;  %v216_v34 = vld [vmem:[%s1378_s2 + $0x40] sm:$0xff]  ;;  %v217_v35 = vld [vmem:[%s1378_s2 + $0x48] sm:$0xff] }
   0x9   :  { %v68_v7 = vrot.slane %v50_v1, %v67_v5  ;;  %v54_v8 = vrot.slane %v50_v1, %v1063_v6  ;;  %v75_v10 = vrot.slane %v50_v1, %v74_v9  ;;  %v82_v12 = vrot.slane %v50_v1, %v81_v11  ;;  %828 = vmatprep.subr.bf16.mxu0 %v984_v17  ;;  %v218_v37 = vld [vmem:[%s1378_s2 + $0x50] sm:$0xff]  ;;  %v219_v38 = vld [vmem:[%s1378_s2 + $0x58] sm:$0xff]  ;;  %v220_v40 = vld [vmem:[%s1378_s2 + $0x60] sm:$0xff] }
   0xa   :  { %v89_v19 = vrot.slane %v50_v1, %v88_v13  ;;  %v61_v21 = vrot.slane %v50_v1, %v60_v14  ;;  %v96_v25 = vrot.slane %v50_v1, %v95_v20  ;;  %v102_v26 = vsub.s32 7, %v1059_v4  ;;  %v221_v41 = vld [vmem:[%s1378_s2 + $0x68] sm:$0xff]  ;;  %v222_v42 = vld [vmem:[%s1378_s2 + $0x70] sm:$0xff]  ;;  %v223_v44 = vld [vmem:[%s1378_s2 + $0x78] sm:$0xff] }
   0xb   :  { %70 = vbcast.lane.b32.xlu1 %v68_v7, 256  ;;  %v226_v29 = vpack.c.bf16 %v213_v28, %v212_v27  ;;  %v227_v33 = vpack.c.bf16 %v215_v32, %v214_v31  ;;  %v228_v36 = vpack.c.bf16 %v217_v35, %v216_v34  ;;  %v229_v39 = vpack.c.bf16 %v219_v38, %v218_v37  ;;  %v314_v46 = vld [vmem:[%s1380_s4] sm:$0xff]  ;;  %v315_v47 = vld [vmem:[%s1380_s4 + $0x8] sm:$0xff]  ;;  %v316_v49 = vld [vmem:[%s1380_s4 + $0x10] sm:$0xff] }
   0xc   :  { %829 = vmatpush3.bf16.msra.mxu0 %v225_v24  ;;  %v103_v30 = vrot.slane %v50_v1, %v102_v26  ;;  %v230_v43 = vpack.c.bf16 %v221_v41, %v220_v40  ;;  %v231_v45 = vpack.c.bf16 %v223_v44, %v222_v42  ;;  %v330_v48 = vpack.c.bf16 %v315_v47, %v314_v46  ;;  %v317_v50 = vld [vmem:[%s1380_s4 + $0x18] sm:$0xff]  ;;  %v318_v52 = vld [vmem:[%s1380_s4 + $0x20] sm:$0xff]  ;;  %v319_v53 = vld [vmem:[%s1380_s4 + $0x28] sm:$0xff] }
   0xd   :  { %830 = vmatprep.subr.bf16.mxu0 %v984_v17  ;;  %v331_v51 = vpack.c.bf16 %v317_v50, %v316_v49  ;;  %v332_v54 = vpack.c.bf16 %v319_v53, %v318_v52  ;;  %v320_v55 = vld [vmem:[%s1380_s4 + $0x30] sm:$0xff]  ;;  %v321_v56 = vld [vmem:[%s1380_s4 + $0x38] sm:$0xff]  ;;  %v322_v58 = vld [vmem:[%s1380_s4 + $0x40] sm:$0xff]  ;;  %vm255_vm4 = vcmask 1043459   ;;  %vm258_vm5 = vcmask 1044484  }
   0xe   :  { %847 = vmatpush3.bf16.msra.mxu1 %v330_v48  ;;  %v333_v57 = vpack.c.bf16 %v321_v56, %v320_v55  ;;  %v323_v59 = vld [vmem:[%s1380_s4 + $0x48] sm:$0xff]  ;;  %v42_v63 = vld [vmem:[%s1376_s0] sm:$0xff]  ;;  %v44_v1 = vld [vmem:[%s1376_s0 + $0x10] sm:$0xff]  ;;  %vm261_vm6 = vcmask 1045509   ;;  %vm264_vm7 = vcmask 1046534   ;;  %vm267_vm8 = vcmask 1047559  }
   0xf   :  { %56 = vbcast.lane.b32.xlu1 %v54_v8, 256  ;;  %848 = vmatprep.subr.bf16.mxu1 %v984_v17  ;;  %v334_v60 = vpack.c.bf16 %v323_v59, %v322_v58  ;;  %v45_v3 = vld [vmem:[%s1376_s0 + $0x18] sm:$0xff]  ;;  %v46_v5 = vld [vmem:[%s1376_s0 + $0x20] sm:$0xff]  ;;  %v48_v20 = vld [vmem:[%s1376_s0 + $0x30] sm:$0xff] }
  0x10   :  { %831 = vmatpush3.bf16.msra.mxu0 %v226_v29  ;;  %v43_v35 = vld [vmem:[%s1376_s0 + $0x8] sm:$0xff] }
  0x11   :  { %832 = vmatprep.subr.bf16.mxu0 %v984_v17 }
  0x12   :  { %849 = vmatpush3.bf16.msra.mxu1 %v331_v51 }
  0x13   :  { %77 = vbcast.lane.b32.xlu1 %v75_v10, 256  ;;  %850 = vmatprep.subr.bf16.mxu1 %v984_v17 }
  0x14   :  { %833 = vmatpush3.bf16.msra.mxu0 %v227_v33 }
  0x15   :  { %834 = vmatprep.subr.bf16.mxu0 %v984_v17 }
  0x16   :  { %851 = vmatpush3.bf16.msra.mxu1 %v332_v54 }
  0x17   :  { %84 = vbcast.lane.b32.xlu1 %v82_v12, 256  ;;  %852 = vmatprep.subr.bf16.mxu1 %v984_v17  ;;  %v47_v12 = vld [vmem:[%s1376_s0 + $0x28] sm:$0xff] }
  0x18   :  { %835 = vmatpush3.bf16.msra.mxu0 %v228_v36 }
  0x19   :  { %836 = vmatprep.subr.bf16.mxu0 %v984_v17 }
  0x1a   :  { %853 = vmatpush3.bf16.msra.mxu1 %v333_v57 }
  0x1b   :  { %91 = vbcast.lane.b32.xlu1 %v89_v19, 256  ;;  %63 = vbcast.lane.b32.xlu0 %v61_v21, 256 }
  0x1c   :  { %837 = vmatpush3.bf16.msra.mxu0 %v229_v39  ;;  %854 = vmatprep.subr.bf16.mxu1 %v984_v17 }
  0x1d   :  { %838 = vmatprep.subr.bf16.mxu0 %v984_v17 }
  0x1e   :  { %855 = vmatpush3.bf16.msra.mxu1 %v334_v60 }
  0x1f   :  { %98 = vbcast.lane.b32.xlu1 %v96_v25, 256  ;;  %856 = vmatprep.subr.bf16.mxu1 %v984_v17 }
  0x20   :  { %839 = vmatpush3.bf16.msra.mxu0 %v230_v43 }
  0x21   :  { %840 = vmatprep.subr.bf16.mxu0 %v984_v17 }
  0x23   :  { %105 = vbcast.lane.b32.xlu1 %v103_v30, 256  ;;  %v49_v30 = vld [vmem:[%s1376_s0 + $0x38] sm:$0xff] }
  0x24   :  { %841 = vmatpush3.bf16.msra.mxu0 %v231_v45 }
  0x25   :  { %866 = vmatprep.subr.bf16.mxu0 %v984_v17 }
  0x7d   :  { %v71_v61 = vpop.permute.xlu1 %70 }
  0x7e   :  { %v109_v7 = vmul.f32 %v71_v61, %v44_v1 }
  0x80   :  { %v127_v13 = vrot.slane %v109_v7, 4 }
  0x81   :  { %v57_v62 = vpop.permute.xlu1 %56 }
  0x82   :  { %v107_v0 = vmul.f32 %v57_v62, %v42_v63  ;;  %v128_v21 = vadd.f32 %v127_v13, %v109_v7 }
  0x84   :  { %v115_v8 = vrot.slane %v107_v0, 4  ;;  %v129_v31 = vrot.slane %v128_v21, 2 }
  0x85   :  { %v78_v2 = vpop.permute.xlu1 %77 }
  0x86   :  { %v110_v9 = vmul.f32 %v78_v2, %v45_v3  ;;  %v116_v14 = vadd.f32 %v115_v8, %v107_v0  ;;  %v130_v54 = vadd.f32 %v129_v31, %v128_v21 }
  0x88   :  { %v133_v15 = vrot.slane %v110_v9, 4  ;;  %v117_v22 = vrot.slane %v116_v14, 2  ;;  %v131_v0 = vrot.slane %v130_v54, 1 }
  0x89   :  { %v85_v10 = vpop.permute.xlu1 %84 }
  0x8a   :  { %v111_v11 = vmul.f32 %v85_v10, %v46_v5  ;;  %v134_v24 = vadd.f32 %v133_v15, %v110_v9  ;;  %v118_v32 = vadd.f32 %v117_v22, %v116_v14  ;;  %v132_v15 = vadd.f32 %v131_v0, %v130_v54 }
  0x8c   :  { %v139_v18 = vrot.slane %v111_v11, 4  ;;  %v135_v36 = vrot.slane %v134_v24, 2  ;;  %v119_v61 = vrot.slane %v118_v32, 1 }
  0x8d   :  { %v92_v16 = vpop.permute.xlu1 %91 }
  0x8e   :  { %v112_v19 = vmul.f32 %v92_v16, %v47_v12  ;;  %v140_v26 = vadd.f32 %v139_v18, %v111_v11  ;;  %v136_v56 = vadd.f32 %v135_v36, %v134_v24  ;;  %v120_v11 = vadd.f32 %v119_v61, %v118_v32 }
  0x90   :  { %v145_v23 = vrot.slane %v112_v19, 4  ;;  %v141_v41 = vrot.slane %v140_v26, 2  ;;  %v137_v2 = vrot.slane %v136_v56, 1 }
  0x91   :  { %v99_v25 = vpop.permute.xlu1 %98 }
  0x92   :  { %v113_v27 = vmul.f32 %v99_v25, %v48_v20  ;;  %v166_v28 = vpop.xlane.xlu0 %165  ;;  %v146_v33 = vadd.f32 %v145_v23, %v112_v19  ;;  %v142_v58 = vadd.f32 %v141_v41, %v140_v26  ;;  %v138_v19 = vadd.f32 %v137_v2, %v136_v56 }
  0x93   :  { %v167_v29 = vmax.f32 %v166_v28, 1.0 }
  0x94   :  { %v151_v34 = vrot.slane %v113_v27, 4  ;;  %v147_v48 = vrot.slane %v146_v33, 2  ;;  %v143_v7 = vrot.slane %v142_v58, 1 }
  0x95   :  { %v170_v37 = vrot.slane %v167_v29, 2  ;;  %v175_v38 = vrot.slane %v167_v29, 7  ;;  %v106_v39 = vpop.permute.xlu1 %105  ;;  %v169_v40 = vrot.slane %v167_v29, 1  ;;  %910 = vrcp.f32 %v167_v29 }
  0x96   :  { %v152_v42 = vadd.f32 %v151_v34, %v113_v27  ;;  %v114_v43 = vmul.f32 %v106_v39, %v49_v30  ;;  %v64_v44 = vpop.permute.xlu0 %63  ;;  %v171_v46 = vrot.slane %v167_v29, 3  ;;  %v172_v47 = vrot.slane %v167_v29, 4 }
  0x97   :  { %912 = vrcp.f32 %v175_v38  ;;  %v108_v45 = vmul.f32 %v64_v44, %v43_v35  ;;  %v173_v52 = vrot.slane %v167_v29, 5  ;;  %v174_v53 = vrot.slane %v167_v29, 6 }
  0x98   :  { %v153_v49 = vrot.slane %v152_v42, 2  ;;  %v157_v50 = vrot.slane %v114_v43, 4  ;;  %914 = vrcp.f32 %v169_v40  ;;  %v148_v62 = vadd.f32 %v147_v48, %v146_v33 }
  0x99   :  { %v121_v51 = vrot.slane %v108_v45, 4  ;;  %916 = vrcp.f32 %v170_v37  ;;  %v144_v23 = vadd.f32 %v143_v7, %v142_v58 }
  0x9a   :  { %v158_v55 = vadd.f32 %v157_v50, %v114_v43  ;;  %918 = vrcp.f32 %v171_v46  ;;  %v154_v59 = vadd.f32 %v153_v49, %v152_v42  ;;  %v149_v12 = vrot.slane %v148_v62, 1 }
  0x9b   :  { %v122_v57 = vadd.f32 %v121_v51, %v108_v45  ;;  %920 = vrcp.f32 %v172_v47 }
  0x9c   :  { %v159_v60 = vrot.slane %v158_v55, 2  ;;  %922 = vrcp.f32 %v173_v52  ;;  %v155_v8 = vrot.slane %v154_v59, 1  ;;  %v150_v27 = vadd.f32 %v149_v12, %v148_v62  ;;  %v527_v62 = vld [vmem:[%s1382_s6] sm:$0xff]  ;;  %v532_v12 = vld [vmem:[%s1382_s6 + $0x28] sm:$0xff] }
  0x9d   :  { %v123_v63 = vrot.slane %v122_v57, 2  ;;  %924 = vrcp.f32 %v174_v53 }
  0x9e   :  { %v160_v1 = vadd.f32 %v159_v60, %v158_v55  ;;  %v156_v24 = vadd.f32 %v155_v8, %v154_v59  ;;  %v529_v8 = vld [vmem:[%s1382_s6 + $0x10] sm:$0xff] }
  0x9f   :  { %v124_v3 = vadd.f32 %v123_v63, %v122_v57  ;;  %v911_v5 = vpop.eup %910  ;;  %v528_v63 = vld [vmem:[%s1382_s6 + $0x8] sm:$0xff] }
  0xa0   :  { %v161_v9 = vrot.slane %v160_v1, 1  ;;  %v185_v21 = vmul.f32 %v911_v5, %v120_v11  ;;  %v543_v5 = vpack.c.bf16 %v528_v63, %v527_v62  ;;  %v531_v11 = vld [vmem:[%s1382_s6 + $0x20] sm:$0xff]  ;;  %v617_v62 = vld [vmem:[%s1383_s7 + $0x50] sm:$0xff]  ;;  %v618_v63 = vld [vmem:[%s1383_s7 + $0x58] sm:$0xff] }
  0xa1   :  { %v913_v10 = vpop.eup %912  ;;  %v125_v13 = vrot.slane %v124_v3, 1 }
  0xa2   :  { %v915_v14 = vpop.eup %914  ;;  %v162_v16 = vadd.f32 %v161_v9, %v160_v1  ;;  %v200_v35 = vpack.c.bf16 %v185_v21, %v185_v21  ;;  %v530_v9 = vld [vmem:[%s1382_s6 + $0x18] sm:$0xff]  ;;  %v324_v21 = vld [vmem:[%s1380_s4 + $0x50] sm:$0xff] }
  0xa3   :  { %v917_v18 = vpop.eup %916  ;;  %v126_v20 = vadd.f32 %v125_v13, %v124_v3  ;;  %v545_v13 = vpack.c.bf16 %v532_v12, %v531_v11 }
  0xa4   :  { %v919_v22 = vpop.eup %918  ;;  %v189_v25 = vmul.f32 %v917_v18, %v132_v15  ;;  %v199_v28 = vmul.f32 %v913_v10, %v162_v16  ;;  %v240_v48 = vunpack.c.l.b16 %v200_v35  ;;  %v544_v10 = vpack.c.bf16 %v530_v9, %v529_v8  ;;  %v534_v15 = vld [vmem:[%s1382_s6 + $0x38] sm:$0xff]  ;;  %v535_v18 = vld [vmem:[%s1382_s6 + $0x40] sm:$0xff]  ;;  %v541_v35 = vld [vmem:[%s1382_s6 + $0x70] sm:$0xff] }
  0xa5   :  { %v921_v26 = vpop.eup %920  ;;  %v187_v29 = vmul.f32 %v915_v14, %v126_v20  ;;  %v191_v30 = vmul.f32 %v919_v22, %v138_v19  ;;  %v533_v14 = vld [vmem:[%s1382_s6 + $0x30] sm:$0xff]  ;;  %v536_v19 = vld [vmem:[%s1382_s6 + $0x48] sm:$0xff]  ;;  %v325_v22 = vld [vmem:[%s1380_s4 + $0x58] sm:$0xff]  ;;  %v986_v9 = vmov 1966171168  }
  0xa6   :  { %v923_v31 = vpop.eup %922  ;;  %v193_v32 = vmul.f32 %v921_v26, %v144_v23  ;;  %v202_v33 = vpack.c.bf16 %v189_v25, %v189_v25  ;;  %v207_v42 = vpack.c.bf16 %v199_v28, %v199_v28  ;;  %v546_v16 = vpack.c.bf16 %v534_v15, %v533_v14  ;;  %v537_v23 = vld [vmem:[%s1382_s6 + $0x50] sm:$0xff]  ;;  %v538_v25 = vld [vmem:[%s1382_s6 + $0x58] sm:$0xff]  ;;  %v327_v28 = vld [vmem:[%s1380_s4 + $0x68] sm:$0xff] }
  0xa7   :  { %v925_v34 = vpop.eup %924  ;;  %v201_v36 = vpack.c.bf16 %v187_v29, %v187_v29  ;;  %v195_v37 = vmul.f32 %v923_v31, %v150_v27  ;;  %v203_v38 = vpack.c.bf16 %v191_v30, %v191_v30  ;;  %v547_v20 = vpack.c.bf16 %v536_v19, %v535_v18  ;;  %v326_v27 = vld [vmem:[%s1380_s4 + $0x60] sm:$0xff]  ;;  %v540_v31 = vld [vmem:[%s1382_s6 + $0x68] sm:$0xff] }
  0xa8   :  { %v197_v39 = vmul.f32 %v925_v34, %v156_v24  ;;  %v204_v40 = vpack.c.bf16 %v193_v32, %v193_v32  ;;  %v242_v41 = vunpack.c.l.b16 %v202_v33  ;;  %v247_v54 = vunpack.c.l.b16 %v207_v42  ;;  %v539_v29 = vld [vmem:[%s1382_s6 + $0x60] sm:$0xff]  ;;  %v328_v33 = vld [vmem:[%s1380_s4 + $0x70] sm:$0xff]  ;;  %v329_v34 = vld [vmem:[%s1380_s4 + $0x78] sm:$0xff] }
  0xa9   :  { %v241_v43 = vunpack.c.l.b16 %v201_v36  ;;  %v205_v44 = vpack.c.bf16 %v195_v37, %v195_v37  ;;  %v243_v45 = vunpack.c.l.b16 %v203_v38  ;;  %v335_v24 = vpack.c.bf16 %v325_v22, %v324_v21  ;;  %v542_v37 = vld [vmem:[%s1382_s6 + $0x78] sm:$0xff] }
  0xaa   :  { %v206_v46 = vpack.c.bf16 %v197_v39, %v197_v39  ;;  %v244_v47 = vunpack.c.l.b16 %v204_v40  ;;  %v251_v52 = vrot.slane %v242_v41, 6  ;;  %v266_v1 = vrot.slane %v247_v54, 1  ;;  %v612_v54 = vld [vmem:[%s1383_s7 + $0x28] sm:$0xff] }
  0xab   :  { %v248_v49 = vrot.slane %v241_v43, 7  ;;  %v245_v50 = vunpack.c.l.b16 %v205_v44  ;;  %v254_v55 = vrot.slane %v243_v45, 5  ;;  %v548_v26 = vpack.c.bf16 %v538_v25, %v537_v23  ;;  %857 = vmatpush3.bf16.msra.mxu1 %v335_v24  ;;  %v607_v43 = vld [vmem:[%s1383_s7] sm:$0xff]  ;;  %v608_v44 = vld [vmem:[%s1383_s7 + $0x8] sm:$0xff] }
  0xac   :  { %v246_v51 = vunpack.c.l.b16 %v206_v46  ;;  %v257_v57 = vrot.slane %v244_v47, 4  ;;  %858 = vmatprep.subr.bf16.mxu1 %v984_v17  ;;  %v336_v30 = vpack.c.bf16 %v327_v28, %v326_v27  ;;  %v549_v32 = vpack.c.bf16 %v540_v31, %v539_v29  ;;  %v525_v45 = vld [vmem:[%s1381_s5] sm:$0xff] }
  0xad   :  { %v250_v53 = vsel %vm249_vm2, %v248_v49, %v240_v48  ;;  %v260_v59 = vrot.slane %v245_v50, 3  ;;  %v337_v36 = vpack.c.bf16 %v329_v34, %v328_v33  ;;  %v550_v38 = vpack.c.bf16 %v542_v37, %v541_v35  ;;  %v609_v50 = vld [vmem:[%s1383_s7 + $0x10] sm:$0xff]  ;;  %v428_v31 = vld [vmem:[%s1379_s3] sm:$0xff] }
  0xae   :  { %v253_v56 = vsel %vm252_vm3, %v251_v52, %v250_v53  ;;  %v263_v61 = vrot.slane %v246_v51, 2  ;;  %v623_v47 = vpack.c.bf16 %v608_v44, %v607_v43  ;;  %v610_v51 = vld [vmem:[%s1383_s7 + $0x18] sm:$0xff]  ;;  %v611_v53 = vld [vmem:[%s1383_s7 + $0x20] sm:$0xff] }
  0xaf   :  { %v256_v58 = vsel %vm255_vm4, %v254_v55, %v253_v56  ;;  %859 = vmatpush3.bf16.msra.mxu1 %v336_v30  ;;  %v624_v52 = vpack.c.bf16 %v610_v51, %v609_v50  ;;  %v625_v55 = vpack.c.bf16 %v612_v54, %v611_v53  ;;  %v613_v56 = vld [vmem:[%s1383_s7 + $0x30] sm:$0xff] }
  0xb0   :  { %v259_v60 = vsel %vm258_vm5, %v257_v57, %v256_v58  ;;  %860 = vmatprep.subr.bf16.mxu1 %v984_v17  ;;  %v614_v57 = vld [vmem:[%s1383_s7 + $0x38] sm:$0xff] }
  0xb1   :  { %v262_v0 = vsel %vm261_vm6, %v260_v59, %v259_v60  ;;  %v626_v58 = vpack.c.bf16 %v614_v57, %v613_v56  ;;  %v615_v59 = vld [vmem:[%s1383_s7 + $0x40] sm:$0xff]  ;;  %v616_v60 = vld [vmem:[%s1383_s7 + $0x48] sm:$0xff] }
  0xb2   :  { %v265_v2 = vsel %vm264_vm7, %v263_v61, %v262_v0  ;;  %v627_v61 = vpack.c.bf16 %v616_v60, %v615_v59  ;;  %v628_v0 = vpack.c.bf16 %v618_v63, %v617_v62 }
  0xb3   :  { %v268_v3 = vsel %vm267_vm8, %v266_v1, %v265_v2  ;;  %861 = vmatpush3.bf16.msra.mxu1 %v337_v36  ;;  %v619_v1 = vld [vmem:[%s1383_s7 + $0x60] sm:$0xff]  ;;  %v620_v2 = vld [vmem:[%s1383_s7 + $0x68] sm:$0xff] }
  0xb4   :  { %v269_v7 = vpack.c.b16 %v268_v3, %v268_v3  ;;  %886 = vmatprep.subr.bf16.mxu1 %v984_v17  ;;  %v629_v3 = vpack.c.bf16 %v620_v2, %v619_v1 }
  0xb6   :  { %843 = vmatmul.mubr.bf16.vlgmr.msra.gmra.mrb[0].mxu0 %v269_v7  ;;  %v622_v7 = vld [vmem:[%s1383_s7 + $0x78] sm:$0xff] }
  0xb7   :  { %867 = vmatpush3.bf16.msra.mxu0 %v543_v5  ;;  %882 = vmatprep.mubr.msk.bf16.mxu0 %vm985_vm1, %v984_v17  ;;  %v621_v5 = vld [vmem:[%s1383_s7 + $0x70] sm:$0xff] }
  0xb8   :  { %868 = vmatprep.subr.bf16.mxu0 %v984_v17  ;;  %v630_v8 = vpack.c.bf16 %v622_v7, %v621_v5 }
  0xbb   :  { %869 = vmatpush3.bf16.msra.mxu0 %v544_v10  ;;  %v381_v10 = vunpack.c.l.s4 %v986_v9 }
  0xbc   :  { %870 = vmatprep.subr.bf16.mxu0 %v984_v17 }
  0xbd   :  { %v382_v11 = vunpack.c.0.s8 %v381_v10 }
  0xbf   :  { %871 = vmatpush3.bf16.msra.mxu0 %v545_v13  ;;  %v385_v12 = vsub.s32 %v382_v11, %v1059_v4 }
  0xc0   :  { %872 = vmatprep.subr.bf16.mxu0 %v984_v17 }
  0xc3   :  { %873 = vmatpush3.bf16.msra.mxu0 %v546_v16 }
  0xc4   :  { %874 = vmatprep.subr.bf16.mxu0 %v984_v17 }
  0xc7   :  { %875 = vmatpush3.bf16.msra.mxu0 %v547_v20 }
  0xc8   :  { %876 = vmatprep.subr.bf16.mxu0 %v984_v17 }
  0xcb   :  { %877 = vmatpush3.bf16.msra.mxu0 %v548_v26 }
  0xcc   :  { %878 = vmatprep.subr.bf16.mxu0 %v984_v17 }
  0xcf   :  { %879 = vmatpush3.bf16.msra.mxu0 %v549_v32 }
  0xd0   :  { %880 = vmatprep.subr.bf16.mxu0 %v984_v17 }
  0xd3   :  { %881 = vmatpush3.bf16.msra.mxu0 %v550_v38 }
 0x189   :  { %v305_v39 = vpop.f32.mrb[0].mxu0 }
 0x18a   :  { %926 = vtanh.f32 %v305_v39  ;;  %v844_v40 = vpop.f32.mrb[1].mxu0 }
 0x18b   :  { %v308_v41 = vpop.f32.mrb[2].mxu0 }
 0x18c   :  { %v845_v42 = vpop.f32.mrb[3].mxu0 }
 0x194   :  { %v927_v46 = vpop.eup %926 }
 0x195   :  { %312 = vst [vmem:[#allocation3] sm:$0xff] %v927_v46  ;;  %v313_v48 = vpack.c.bf16 %v927_v46, %v927_v46  ;;  %v526_v49 = vpack.c.bf16 %v525_v45, %v927_v46 }
 0x197   :  { %863 = vmatmul.mubr.bf16.vlgmr.msra.gmra.mrb[0].mxu1 %v313_v48  ;;  %883 = vmatmul.mubr.bf16.vlgmr.msra.gmra.mrb[4].mxu0 %v526_v49 }
 0x198   :  { %887 = vmatpush3.bf16.msra.mxu1 %v623_v47  ;;  %902 = vmatprep.mubr.msk.bf16.mxu1 %vm985_vm1, %v984_v17 }
 0x199   :  { %888 = vmatprep.subr.bf16.mxu1 %v984_v17 }
 0x19c   :  { %889 = vmatpush3.bf16.msra.mxu1 %v624_v52 }
 0x19d   :  { %890 = vmatprep.subr.bf16.mxu1 %v984_v17 }
 0x1a0   :  { %891 = vmatpush3.bf16.msra.mxu1 %v625_v55 }
 0x1a1   :  { %892 = vmatprep.subr.bf16.mxu1 %v984_v17 }
 0x1a4   :  { %893 = vmatpush3.bf16.msra.mxu1 %v626_v58 }
 0x1a5   :  { %894 = vmatprep.subr.bf16.mxu1 %v984_v17 }
 0x1a8   :  { %895 = vmatpush3.bf16.msra.mxu1 %v627_v61 }
 0x1a9   :  { %896 = vmatprep.subr.bf16.mxu1 %v984_v17 }
 0x1ac   :  { %897 = vmatpush3.bf16.msra.mxu1 %v628_v0 }
 0x1ad   :  { %898 = vmatprep.subr.bf16.mxu1 %v984_v17 }
 0x1b0   :  { %899 = vmatpush3.bf16.msra.mxu1 %v629_v3 }
 0x1b1   :  { %900 = vmatprep.subr.bf16.mxu1 %v984_v17 }
 0x1b4   :  { %901 = vmatpush3.bf16.msra.mxu1 %v630_v8 }
 0x26a   :  { %v372_v13 = vpop.f32.mrb[0].mxu1  ;;  %v585_v14 = vpop.f32.mrb[4].mxu0 }
 0x26b   :  { %v379_v15 = vcombine.high %v372_v13, %v372_v13  ;;  %v386_v16 = vrot.slane %v372_v13, %v385_v12  ;;  %v594_v17 = vmul.f32 1.442695, %v585_v14  ;;  %v864_v18 = vpop.f32.mrb[1].mxu1  ;;  %v884_v19 = vpop.f32.mrb[5].mxu0  ;;  %vm592_vm9 = vcmp.gt.f32.partialorder %v585_v14, 0.0 }
 0x26c   :  { %v375_v20 = vpop.f32.mrb[2].mxu1  ;;  %v588_v21 = vpop.f32.mrb[6].mxu0 }
 0x26d   :  { %v393_v22 = vrot.slane %v379_v15, %v385_v12  ;;  %v394_v23 = vcombine.high %v386_v16, %v386_v16  ;;  %v402_v24 = vrot.slane %v386_v16, %v385_v12  ;;  %928 = vpow2.f32 %v594_v17  ;;  %v865_v25 = vpop.f32.mrb[3].mxu1  ;;  %v885_v26 = vpop.f32.mrb[7].mxu0 }
 0x26e   :  { %v596_v27 = vmul.f32 1.442695, %v588_v21  ;;  %vm593_vm10 = vcmp.gt.f32.partialorder %v588_v21, 0.0  ;;  %v757_v25 = vld [vmem:[%s1384_s8] ss:$0 sm:$0xff] }
 0x26f   :  { %v395_v28 = vcombine.high %v393_v22, %v393_v22  ;;  %v409_v29 = vrot.slane %v393_v22, %v385_v12  ;;  %v416_v30 = vrot.slane %v394_v23, %v385_v12  ;;  %v424_v4 = vcombine.high %v402_v24, %v402_v24 }
 0x270   :  { %v432_v32 = vrot.slane %v402_v24, %v1063_v6  ;;  %930 = vpow2.f32 %v596_v27 }
 0x271   :  { %v423_v33 = vrot.slane %v395_v28, %v385_v12  ;;  %v425_v34 = vcombine.high %v409_v29, %v409_v29  ;;  %v426_v35 = vcombine.high %v416_v30, %v416_v30  ;;  %v436_v36 = vrot.slane %v416_v30, %v1063_v6 }
 0x272   :  { %v440_v37 = vrot.slane %v424_v4, %v1063_v6  ;;  %v448_v38 = vrot.slane %v409_v29, %v1063_v6  ;;  %v469_v39 = vadd.f32 %v432_v32, %v428_v31 }
 0x273   :  { %v427_v40 = vcombine.high %v423_v33, %v423_v33  ;;  %v444_v41 = vrot.slane %v426_v35, %v1063_v6  ;;  %v452_v42 = vrot.slane %v423_v33, %v1063_v6  ;;  %v456_v43 = vrot.slane %v425_v34, %v1063_v6 }
 0x274   :  { %v470_v44 = vadd.f32 %v436_v36, %v428_v31  ;;  %v471_v45 = vadd.f32 %v440_v37, %v428_v31  ;;  %v473_v48 = vadd.f32 %v448_v38, %v428_v31  ;;  %932 = vtanh.f32 %v469_v39 }
 0x275   :  { %v460_v46 = vrot.slane %v427_v40, %v1063_v6  ;;  %v472_v47 = vadd.f32 %v444_v41, %v428_v31  ;;  %v474_v49 = vadd.f32 %v452_v42, %v428_v31  ;;  %v475_v51 = vadd.f32 %v456_v43, %v428_v31 }
 0x276   :  { %934 = vtanh.f32 %v470_v44 }
 0x277   :  { %v929_v50 = vpop.eup %928  ;;  %936 = vtanh.f32 %v471_v45  ;;  %v476_v52 = vadd.f32 %v460_v46, %v428_v31 }
 0x278   :  { %938 = vtanh.f32 %v472_v47  ;;  %v753_v53 = vadd.f32 -1.0, %v929_v50 }
 0x279   :  { %940 = vtanh.f32 %v473_v48 }
 0x27a   :  { %v931_v54 = vpop.eup %930  ;;  %942 = vtanh.f32 %v474_v49  ;;  %v600_v55 = vmul.f32 1.6732632, %v753_v53 }
 0x27b   :  { %944 = vtanh.f32 %v475_v51  ;;  %v754_v56 = vadd.f32 -1.0, %v931_v54 }
 0x27c   :  { %946 = vtanh.f32 %v476_v52  ;;  %v602_v6 = vsel %vm592_vm9, %v585_v14, %v600_v55 }
 0x27d   :  { %v601_v57 = vmul.f32 1.6732632, %v754_v56  ;;  %v604_v61 = vmul.f32 1.050701, %v602_v6 }
 0x27e   :  { %v933_v58 = vpop.eup %932 }
 0x27f   :  { %v603_v59 = vsel %vm593_vm10, %v588_v21, %v601_v57 }
 0x280   :  { %v935_v60 = vpop.eup %934  ;;  %v605_v62 = vmul.f32 1.050701, %v603_v59 }
 0x281   :  { %v937_v63 = vpop.eup %936  ;;  %v770_v0 = vpack.c.bf16 %v935_v60, %v933_v58 }
 0x282   :  { %v939_v1 = vpop.eup %938  ;;  %v606_v2 = vpack.c.bf16 %v605_v62, %v604_v61 }
 0x283   :  { %v941_v3 = vpop.eup %940  ;;  %771 = vst [vmem:[%s1387_s11] sm:$0xff] %v770_v0   ;;  %v775_v5 = vpack.c.bf16 %v939_v1, %v937_v63 }
 0x284   :  { %v943_v7 = vpop.eup %942  ;;  %903 = vmatmul.mubr.bf16.vlgmr.msra.gmra.mrb[4].mxu1 %v606_v2 }
 0x285   :  { %v945_v8 = vpop.eup %944  ;;  %787 = vst [vmem:[%s1387_s11 + $0x8] sm:$0xff] %v775_v5   ;;  %v780_v9 = vpack.c.bf16 %v943_v7, %v941_v3 }
 0x286   :  { %v947_v10 = vpop.eup %946 }
 0x287   :  { %788 = vst [vmem:[%s1387_s11 + $0x10] sm:$0xff] %v780_v9   ;;  %v785_v11 = vpack.c.bf16 %v947_v10, %v945_v8 }
 0x289   :  { %789 = vst [vmem:[%s1387_s11 + $0x18] sm:$0xff] %v785_v11   ;;  %s987_s11 = smov [#allocation3]  }
 0x28a   :  { %s729_s1 = sshll.u32 %s987_s11, 4  ;;  %s730_s1 = int_to_ptr.vmem [resolvable:$true] %s729_s1 }
 0x28b   :  { %s960_s9 = scalar_lea.vmem %s730_s1, 128  ;;  %p965_p1 = scmp.lt.s32.totalorder %s730_s1, %s730_s1 }
 0x28c   :  { %p961_p0 = scmp.ne.s32.totalorder %s730_s1, %s960_s9  ;;  %p966_p2 = scmp.lt.s32.totalorder %s960_s9, %s960_s9 }
 0x28e   :  { %p967_p3 = por %p966_p2, %p965_p1 }
 0x290   :  { %p968_p4 = pnand %p967_p3, %p961_p0 }
 0x357   :  { %v665_v12 = vpop.f32.mrb[4].mxu1 }
 0x358   :  { %v674_v13 = vmul.f32 1.442695, %v665_v12  ;;  %v904_v14 = vpop.f32.mrb[5].mxu1  ;;  %vm672_vm11 = vcmp.gt.f32.partialorder %v665_v12, 0.0 }
 0x359   :  { %v668_v15 = vpop.f32.mrb[6].mxu1 }
 0x35a   :  { %948 = vpow2.f32 %v674_v13  ;;  %v676_v16 = vmul.f32 1.442695, %v668_v15  ;;  %v905_v17 = vpop.f32.mrb[7].mxu1  ;;  %vm673_vm12 = vcmp.gt.f32.partialorder %v668_v15, 0.0 }
 0x35c   :  { %950 = vpow2.f32 %v676_v16 }
 0x364   :  { %v949_v18 = vpop.eup %948 }
 0x365   :  { %v755_v19 = vadd.f32 -1.0, %v949_v18 }
 0x366   :  { %v951_v20 = vpop.eup %950 }
 0x367   :  { %v680_v21 = vmul.f32 1.6732632, %v755_v19  ;;  %v756_v22 = vadd.f32 -1.0, %v951_v20 }
 0x369   :  { %v682_v23 = vsel %vm672_vm11, %v665_v12, %v680_v21  ;;  %v681_v24 = vmul.f32 1.6732632, %v756_v22 }
 0x36a   :  { %v684_v26 = vmul.f32 1.050701, %v682_v23 }
 0x36b   :  { %v683_v27 = vsel %vm673_vm12, %v668_v15, %v681_v24 }
 0x36c   :  { %v693_v28 = vmul.f32 %v757_v25, %v684_v26  ;;  %v685_v29 = vmul.f32 1.050701, %v683_v27 }
 0x36e   :  { %695 = vadd.xlane.f32.xlu0 %v693_v28  ;;  %v694_v30 = vmul.f32 %v757_v25, %v685_v29 }
 0x370   :  { %697 = vadd.xlane.f32.xlu1 %v694_v30 }
 0x371   :  { %971 = shalt.err (!%p968_p4)
}
 0x372   :  { %s972_s26 = scalar_lea.hbm %s1386_s10, 128 }
 0x373   :  { %p973_p5 = scmp.ne.s32.totalorder %s1386_s10, %s972_s26  ;;  %p976_p6 = scmp.lt.u32.totalorder %s972_s26, %s1386_s10 }
 0x375   :  { %p978_p7 = pnand %p976_p6, %p973_p5 }
 0x377   :  { %981 = shalt.err (!%p978_p7)
}
 0x378   :  { %732 = dma.vmem_to_hbm [thread:$0]  %s730_s1, 128, %s1386_s10, [#allocation4]   ;;  %v758_v4 = vld [vmem:[#allocation2] ss:$0 sm:$0xff]  ;;  %vm720_vm13 = vcmask 7168  }
 0x3fb   :  { %v696_v31 = vpop.xlane.xlu0 %695 }
 0x3fc   :  { %v706_v32 = vadd.f32 %v758_v4, %v696_v31 }
 0x3fd   :  { %v698_v33 = vpop.xlane.xlu1 %697 }
 0x3fe   :  { %v708_v34 = vsub.f32 0.0, %v706_v32  ;;  %v707_v35 = vadd.f32 %v758_v4, %v698_v33 }
 0x400   :  { %v710_v36 = vmul.f32 1.442695, %v708_v34  ;;  %v709_v37 = vsub.f32 0.0, %v707_v35 }
 0x402   :  { %952 = vpow2.f32 %v710_v36  ;;  %v712_v38 = vmul.f32 1.442695, %v709_v37 }
 0x404   :  { %954 = vpow2.f32 %v712_v38 }
 0x40c   :  { %v953_v39 = vpop.eup %952 }
 0x40d   :  { %v714_v40 = vadd.f32 1.0, %v953_v39 }
 0x40e   :  { %v955_v41 = vpop.eup %954 }
 0x40f   :  { %956 = vrcp.f32 %v714_v40  ;;  %v715_v42 = vadd.f32 1.0, %v955_v41 }
 0x411   :  { %958 = vrcp.f32 %v715_v42 }
 0x419   :  { %v957_v43 = vpop.eup %956 }
 0x41a   :  { %721 = vst.msk [vmem:[%s1388_s12] sm:$0xff] %vm720_vm13, %v957_v43 }
 0x41b   :  { %v959_v44 = vpop.eup %958 }
 0x41c   :  { %722 = vst.msk [vmem:[%s1388_s12 + $0x8] sm:$0xff] %vm720_vm13, %v959_v44 }
 0x41d   :  { %982 = dma.done.wait [#allocation4], 128  }
 0x41e   :  { %983 = vsyncadd [#allocation4], 4294967168 }
 0x41f   :  { %744 = vsyncpa [#allocation4], 1 }

</bundles_post_ra>
